<compile_context>
chip_gen: v6e
topology: v6e:2x2x1
jax: 0.10.0
libtpu: 0.0.40
codegen_flags: <defaults>
</compile_context>

<pallas_src>
import numpy as np
import jax
import jax.numpy as jnp
from jax import lax
from jax.experimental import pallas as pl
from jax.experimental.pallas import tpu as pltpu

BN_EPS = 1e-5          # nn.BatchNorm2d default eps
LEAKY_SLOPE = 1.0      # nn.LeakyReLU(True) -> negative_slope == 1.0 == identity (see NOTE above)


# ------------------------- layout plan for the packed constants buffer -------------------------

def _round_up(x, m):
    return (x + m - 1) // m * m


def _plan(batch, patch_size, encoded_dim):
    P, D = patch_size, encoded_dim
    assert P % 8 == 0, "patch_size must be divisible by 8"
    H2, H3 = P // 4, P // 8
    F1 = P * P                 # x flattened per sample (C=1)
    F2 = 16 * H2 * H2          # conv2 output flattened (c,h,w)
    F3 = 32 * H3 * H3          # conv3 output flattened (c,h,w)  (== P*P//2 == lin1 in-features)
    Dp = 128                   # lane-padded encoder output width
    assert D <= Dp, "encoded_space_dim must be <= 128 for this packing"
    L = _round_up(max(F2, F3 + Dp), 128)
    # Compact side-by-side packing needs these alignments (hold for patch_size=16):
    assert F2 == 2 * F3 and F3 % 128 == 0 and F1 % 8 == 0 and F2 % 8 == 0
    a12 = 0                    # rows [a12, a12+F1), lanes [0, F2)
    gm2 = F1                   # rows [gm2, gm2+F2), lanes [0, F2)
    a3 = F1 + F2               # rows [a3,  a3+F2),  lanes [0, F3)
    gm3 = a3                   # rows [gm3, gm3+F3), lanes [F3, 2*F3)
    w12 = a3 + F3              # rows [w12, w12+F3), lanes [F3, F3+Dp)
    rc = a3 + F2               # 8 rows of per-lane constants
    rows = rc + 8
    return dict(N=batch, P=P, D=D, Dp=Dp, H2=H2, H3=H3, F1=F1, F2=F2, F3=F3, L=L,
                rows=rows, a12=a12, gm2=gm2, a3=a3, gm3=gm3, w12=w12, rc=rc)


# ------------------------- fused Pallas kernel (5 MXU pushes total) -------------------------

def _make_kernel(pln):
    F1, F2, F3, D, Dp = pln["F1"], pln["F2"], pln["F3"], pln["D"], pln["Dp"]
    a12, gm2, a3, gm3, w12, rc = (pln["a12"], pln["gm2"], pln["a3"],
                                  pln["gm3"], pln["w12"], pln["rc"])
    f32 = jnp.float32

    def batchnorm(y, gm, g_row, b_row):
        # Training-mode BN (biased variance over the whole batch), one-pass E[y^2]-mean^2.
        L = y.shape[-1]
        rsum = jnp.sum(y, axis=0, keepdims=True)            # (1, L) sublane reduce
        ssum = jnp.sum(y * y, axis=0, keepdims=True)        # (1, L)
        # Concat-free stack [rsum; ssum] so both stats ride a SINGLE MXU push against Gm.
        row0 = lax.broadcasted_iota(jnp.int32, (2, L), 0) == 0
        stats = jnp.where(row0, jnp.broadcast_to(rsum, (2, L)),
                          jnp.broadcast_to(ssum, (2, L)))
        mb = jnp.dot(stats, gm, preferred_element_type=f32)  # per-channel mean / E[y^2], lane-broadcast
        mean, ex2 = mb[0:1, :], mb[1:2, :]
        var = jnp.maximum(ex2 - mean * mean, 0.0)
        scale = g_row * lax.rsqrt(var + BN_EPS)               # rsqrt -> EUP slot (free)
        return (y - mean) * scale + b_row

    def kernel(x_ref, c_ref, o_ref):
        # conv1 ∘ conv2 folded into one dense operator (identity LeakyReLU(True) in between).
        y2 = jnp.dot(x_ref[...], c_ref[a12:a12 + F1, 0:F2], preferred_element_type=f32)
        y2 = y2 + c_ref[rc + 0:rc + 1, 0:F2]
        y2 = batchnorm(y2, c_ref[gm2:gm2 + F2, 0:F2],
                       c_ref[rc + 1:rc + 2, 0:F2], c_ref[rc + 2:rc + 3, 0:F2])

        # conv3 folded into one dense operator.
        y3 = jnp.dot(y2, c_ref[a3:a3 + F2, 0:F3], preferred_element_type=f32)
        y3 = y3 + c_ref[rc + 3:rc + 4, 0:F3]
        y3 = batchnorm(y3, c_ref[gm3:gm3 + F3, F3:2 * F3],
                       c_ref[rc + 4:rc + 5, 0:F3], c_ref[rc + 5:rc + 6, 0:F3])

        # flatten (lanes already in PyTorch (c,h,w) order) + lin1 ∘ lin2 folded (lane-padded).
        out = jnp.dot(y3, c_ref[w12:w12 + F3, F3:F3 + Dp], preferred_element_type=f32)
        out = out + c_ref[rc + 6:rc + 7, 0:Dp]
        o_ref[...] = out[:, 0:D]

    return kernel


def make_encoder_forward(batch, patch_size, encoded_space_dim):
    pln = _plan(batch, patch_size, encoded_space_dim)
    kernel = _make_kernel(pln)
    N, F1, F2, F3, D, Dp = pln["N"], pln["F1"], pln["F2"], pln["F3"], pln["D"], pln["Dp"]
    vmem = pl.BlockSpec(memory_space=pltpu.MemorySpace.VMEM)
    flops = 2 * (N * F1 * F2 + 2 * F2 * F2 + N * F2 * F3 + 2 * F3 * F3 + N * F3 * Dp)
    bytes_accessed = 4 * (pln["rows"] * pln["L"] + N * F1 + N * D)

    call = pl.pallas_call(
        kernel,
        out_shape=jax.ShapeDtypeStruct((N, D), jnp.float32),
        in_specs=[vmem, vmem],            # exactly 2 input DMAs: x + packed constants
        out_specs=vmem,
        cost_estimate=pl.CostEstimate(flops=int(flops), transcendentals=int(F2 + F3),
                                      bytes_accessed=int(bytes_accessed)),
    )

    @jax.jit
    def forward(consts, x):
        return call(x.reshape(N, F1), consts)   # NCHW with C=1 -> free row-major flatten

    return forward


# ------------------------- one-time host-side parameter preparation -------------------------

def prepare_params(params, batch, patch_size, encoded_space_dim):
    """Fold the PyTorch weights into the packed constants buffer (one-time, host-side)."""
    pln = _plan(batch, patch_size, encoded_space_dim)
    N, P = pln["N"], pln["P"]
    F1, F2, F3, D = pln["F1"], pln["F2"], pln["F3"], pln["D"]
    H2, H3 = pln["H2"], pln["H3"]
    hi = lax.Precision.HIGHEST

    def conv(x, w):
        return lax.conv_general_dilated(x, w, (2, 2), ((1, 1), (1, 1)),
                                        dimension_numbers=("NCHW", "OIHW", "NCHW"),
                                        precision=hi)

    w1c, b1c = params["conv1_w"], params["conv1_b"]
    w2c, b2c = params["conv2_w"], params["conv2_b"]
    w3c = params["conv3_w"]

    # Dense Jacobian of conv2∘conv1 (biasless) via the identity basis; exact since the map is
    # linear and the interposed LeakyReLU(True) has slope 1.0 (identity).
    basis1 = jnp.eye(F1, dtype=jnp.float32).reshape(F1, 1, P, P)
    A12 = np.asarray(conv(conv(basis1, w1c), w2c).reshape(F1, F2))
    zero = jnp.zeros((1, 1, P, P), jnp.float32)
    bias12 = np.asarray((conv(conv(zero, w1c) + b1c[None, :, None, None], w2c)
                         + b2c[None, :, None, None]).reshape(F2))

    # Dense Jacobian of conv3 (biasless) on the (c,h,w)-flattened conv2 activation.
    basis2 = jnp.eye(F2, dtype=jnp.float32).reshape(F2, 16, H2, H2)
    A3 = np.asarray(conv(basis2, w3c).reshape(F2, F3))
    bias3 = np.repeat(np.asarray(params["conv3_b"], np.float32), H3 * H3)

    # BN constants: per-channel mean/broadcast matrices (block-diagonal, count-normalized).
    Gm2 = np.kron(np.eye(16, dtype=np.float32),
                  np.full((H2 * H2, H2 * H2), 1.0 / (N * H2 * H2), np.float32))
    Gm3 = np.kron(np.eye(32, dtype=np.float32),
                  np.full((H3 * H3, H3 * H3), 1.0 / (N * H3 * H3), np.float32))
    g2 = np.repeat(np.asarray(params["bn2_g"], np.float32), H2 * H2)
    be2 = np.repeat(np.asarray(params["bn2_b"], np.float32), H2 * H2)
    g3 = np.repeat(np.asarray(params["bn3_g"], np.float32), H3 * H3)
    be3 = np.repeat(np.asarray(params["bn3_b"], np.float32), H3 * H3)

    # lin1 ∘ lin2 folded (identity LeakyReLU(True) in between).
    W12 = np.asarray(jnp.dot(params["lin1_w"].T, params["lin2_w"].T, precision=hi))
    b12 = np.asarray(jnp.dot(params["lin1_b"], params["lin2_w"].T, precision=hi)
                     + params["lin2_b"])

    consts = np.zeros((pln["rows"], pln["L"]), np.float32)
    consts[pln["a12"]:pln["a12"] + F1, 0:F2] = A12
    consts[pln["gm2"]:pln["gm2"] + F2, 0:F2] = Gm2
    consts[pln["a3"]:pln["a3"] + F2, 0:F3] = A3
    consts[pln["gm3"]:pln["gm3"] + F3, F3:2 * F3] = Gm3
    consts[pln["w12"]:pln["w12"] + F3, F3:F3 + D] = W12
    rc = pln["rc"]
    consts[rc + 0, 0:F2] = bias12
    consts[rc + 1, 0:F2] = g2
    consts[rc + 2, 0:F2] = be2
    consts[rc + 3, 0:F3] = bias3
    consts[rc + 4, 0:F3] = g3
    consts[rc + 5, 0:F3] = be3
    consts[rc + 6, 0:D] = b12
    return jnp.asarray(consts)


# ------------------------- PyTorch-shaped parameter init & pure-JAX reference -------------------------

def init_params(key, patch_size, encoded_space_dim):
    ks = jax.random.split(key, 10)

    def u(k, shape, fan_in):
        bound = 1.0 / jnp.sqrt(jnp.float32(fan_in))
        return jax.random.uniform(k, shape, jnp.float32, -bound, bound)

    feat = patch_size ** 2 // 2
    return {
        "conv1_w": u(ks[0], (8, 1, 4, 4), 1 * 16),
        "conv1_b": u(ks[1], (8,), 1 * 16),
        "conv2_w": u(ks[2], (16, 8, 4, 4), 8 * 16),
        "conv2_b": u(ks[3], (16,), 8 * 16),
        "bn2_g": jnp.ones((16,), jnp.float32),
        "bn2_b": jnp.zeros((16,), jnp.float32),
        "conv3_w": u(ks[4], (32, 16, 4, 4), 16 * 16),
        "conv3_b": u(ks[5], (32,), 16 * 16),
        "bn3_g": jnp.ones((32,), jnp.float32),
        "bn3_b": jnp.zeros((32,), jnp.float32),
        "lin1_w": u(ks[6], (128, feat), feat),
        "lin1_b": u(ks[7], (128,), feat),
        "lin2_w": u(ks[8], (encoded_space_dim, 128), 128),
        "lin2_b": u(ks[9], (encoded_space_dim,), 128),
    }


def reference_forward(params, x):
    hi = lax.Precision.HIGHEST

    def conv(y, w, b):
        out = lax.conv_general_dilated(y, w, window_strides=(2, 2),
                                       padding=((1, 1), (1, 1)),
                                       dimension_numbers=("NCHW", "OIHW", "NCHW"),
                                       precision=hi)
        return out + b[None, :, None, None]

    def bn(y, g, b):
        m = jnp.mean(y, axis=(0, 2, 3), keepdims=True)
        v = jnp.mean((y - m) ** 2, axis=(0, 2, 3), keepdims=True)
        return g[None, :, None, None] * (y - m) * lax.rsqrt(v + BN_EPS) + b[None, :, None, None]

    # LeakyReLU(True) has negative_slope == 1.0 -> identity, omitted.
    y = conv(x, params["conv1_w"], params["conv1_b"])
    y = bn(conv(y, params["conv2_w"], params["conv2_b"]), params["bn2_g"], params["bn2_b"])
    y = bn(conv(y, params["conv3_w"], params["conv3_b"]), params["bn3_g"], params["bn3_b"])
    feat = y.reshape(y.shape[0], -1)
    h = jnp.dot(feat, params["lin1_w"].T, precision=hi) + params["lin1_b"]
    return jnp.dot(h, params["lin2_w"].T, precision=hi) + params["lin2_b"]


if __name__ == "__main__":
    patch_size = 16            # flattened conv features = 16**2 // 2 = 128
    encoded_space_dim = 8
    batch = 2

    key = jax.random.PRNGKey(0)
    k_par, k_x = jax.random.split(key)
    params = init_params(k_par, patch_size, encoded_space_dim)
    x = jax.random.normal(k_x, (batch, 1, patch_size, patch_size), jnp.float32)

    consts = prepare_params(params, batch, patch_size, encoded_space_dim)   # one-time prep
    forward = make_encoder_forward(batch, patch_size, encoded_space_dim)

    out = jax.block_until_ready(forward(consts, x))
    assert out.shape == (batch, encoded_space_dim), out.shape
    assert bool(jnp.all(jnp.isfinite(out)))

    ref = jax.block_until_ready(reference_forward(params, x))
    assert jnp.allclose(out, ref, atol=1e-2, rtol=1e-2), float(jnp.max(jnp.abs(out - ref)))
    print("KERNEL_OK")
</pallas_src>

<mosaic_0001>
module attributes {stable_mosaic.version = 11 : i64} {
  func.func @kernel(%arg0: memref<2x256xf32, #tpu.memory_space<vmem>>, %arg1: memref<776x256xf32, #tpu.memory_space<vmem>>, %arg2: memref<2x8xf32, #tpu.memory_space<vmem>>) attributes {dimension_semantics = [], scalar_prefetch = 0 : i64, scratch_operands = 0 : i64, tpu.core_type = #tpu.core_type<tc>} {
    %c0 = arith.constant 0 : index
    %c0_0 = arith.constant 0 : index
    %0 = vector.load %arg0[%c0, %c0_0] : memref<2x256xf32, #tpu.memory_space<vmem>>, vector<2x256xf32>
    %c0_1 = arith.constant 0 : index
    %c0_2 = arith.constant 0 : index
    %1 = vector.load %arg1[%c0_1, %c0_2] : memref<776x256xf32, #tpu.memory_space<vmem>>, vector<256x256xf32>
    %cst = arith.constant dense<0.000000e+00> : vector<2x256xf32>
    %2 = tpu.matmul %0, %1, %cst {dimension_numbers = #tpu.dot_dimension_numbers<[1], [0], [0], [1], [0, 0, 1, 1], [], []>} : vector<2x256xf32>, vector<256x256xf32>, vector<2x256xf32> -> vector<2x256xf32>
    %c768 = arith.constant 768 : index
    %c0_3 = arith.constant 0 : index
    %3 = vector.load %arg1[%c768, %c0_3] : memref<776x256xf32, #tpu.memory_space<vmem>>, vector<1x256xf32>
    %4 = vector.broadcast %3 : vector<1x256xf32> to vector<2x256xf32>
    %5 = arith.addf %2, %4 : vector<2x256xf32>
    %c256 = arith.constant 256 : index
    %c0_4 = arith.constant 0 : index
    %6 = vector.load %arg1[%c256, %c0_4] : memref<776x256xf32, #tpu.memory_space<vmem>>, vector<256x256xf32>
    %c769 = arith.constant 769 : index
    %c0_5 = arith.constant 0 : index
    %7 = vector.load %arg1[%c769, %c0_5] : memref<776x256xf32, #tpu.memory_space<vmem>>, vector<1x256xf32>
    %c770 = arith.constant 770 : index
    %c0_6 = arith.constant 0 : index
    %8 = vector.load %arg1[%c770, %c0_6] : memref<776x256xf32, #tpu.memory_space<vmem>>, vector<1x256xf32>
    %cst_7 = arith.constant dense<0.000000e+00> : vector<256xf32>
    %9 = vector.multi_reduction <add>, %5, %cst_7 [0] : vector<2x256xf32> to vector<256xf32>
    %10 = vector.shape_cast %9 : vector<256xf32> to vector<1x256xf32>
    %11 = arith.mulf %5, %5 : vector<2x256xf32>
    %cst_8 = arith.constant dense<0.000000e+00> : vector<256xf32>
    %12 = vector.multi_reduction <add>, %11, %cst_8 [0] : vector<2x256xf32> to vector<256xf32>
    %13 = vector.shape_cast %12 : vector<256xf32> to vector<1x256xf32>
    %14 = tpu.iota {dimensions = array<i32: 0>} : vector<2x256xi32>
    %c0_i32 = arith.constant 0 : i32
    %15 = vector.broadcast %c0_i32 : i32 to vector<2x256xi32>
    %16 = arith.cmpi eq, %14, %15 : vector<2x256xi32>
    %17 = vector.shape_cast %10 : vector<1x256xf32> to vector<1x256xf32>
    %18 = vector.broadcast %17 : vector<1x256xf32> to vector<2x256xf32>
    %19 = vector.shape_cast %13 : vector<1x256xf32> to vector<1x256xf32>
    %20 = vector.broadcast %19 : vector<1x256xf32> to vector<2x256xf32>
    %21 = arith.select %16, %18, %20 : vector<2x256xi1>, vector<2x256xf32>
    %cst_9 = arith.constant dense<0.000000e+00> : vector<2x256xf32>
    %22 = tpu.matmul %21, %6, %cst_9 {dimension_numbers = #tpu.dot_dimension_numbers<[1], [0], [0], [1], [0, 0, 1, 1], [], []>} : vector<2x256xf32>, vector<256x256xf32>, vector<2x256xf32> -> vector<2x256xf32>
    %23 = vector.extract_strided_slice %22 {offsets = [0, 0], sizes = [1, 256], strides = [1, 1]} : vector<2x256xf32> to vector<1x256xf32>
    %24 = vector.extract_strided_slice %22 {offsets = [1, 0], sizes = [1, 256], strides = [1, 1]} : vector<2x256xf32> to vector<1x256xf32>
    %25 = arith.mulf %23, %23 : vector<1x256xf32>
    %26 = arith.subf %24, %25 : vector<1x256xf32>
    %cst_10 = arith.constant 0.000000e+00 : f32
    %27 = vector.broadcast %cst_10 : f32 to vector<1x256xf32>
    %28 = arith.maximumf %26, %27 : vector<1x256xf32>
    %cst_11 = arith.constant 9.99999974E-6 : f32
    %29 = vector.broadcast %cst_11 : f32 to vector<1x256xf32>
    %30 = arith.addf %28, %29 : vector<1x256xf32>
    %31 = math.rsqrt %30 : vector<1x256xf32>
    %32 = arith.mulf %7, %31 : vector<1x256xf32>
    %33 = vector.broadcast %23 : vector<1x256xf32> to vector<2x256xf32>
    %34 = arith.subf %5, %33 : vector<2x256xf32>
    %35 = vector.broadcast %32 : vector<1x256xf32> to vector<2x256xf32>
    %36 = arith.mulf %34, %35 : vector<2x256xf32>
    %37 = vector.broadcast %8 : vector<1x256xf32> to vector<2x256xf32>
    %38 = arith.addf %36, %37 : vector<2x256xf32>
    %c512 = arith.constant 512 : index
    %c0_12 = arith.constant 0 : index
    %39 = vector.load %arg1[%c512, %c0_12] : memref<776x256xf32, #tpu.memory_space<vmem>>, vector<256x128xf32>
    %cst_13 = arith.constant dense<0.000000e+00> : vector<2x128xf32>
    %40 = tpu.matmul %38, %39, %cst_13 {dimension_numbers = #tpu.dot_dimension_numbers<[1], [0], [0], [1], [0, 0, 1, 1], [], []>} : vector<2x256xf32>, vector<256x128xf32>, vector<2x128xf32> -> vector<2x128xf32>
    %c771 = arith.constant 771 : index
    %c0_14 = arith.constant 0 : index
    %41 = vector.load %arg1[%c771, %c0_14] : memref<776x256xf32, #tpu.memory_space<vmem>>, vector<1x128xf32>
    %42 = vector.broadcast %41 : vector<1x128xf32> to vector<2x128xf32>
    %43 = arith.addf %40, %42 : vector<2x128xf32>
    %c512_15 = arith.constant 512 : index
    %c128 = arith.constant 128 : index
    %44 = vector.load %arg1[%c512_15, %c128] : memref<776x256xf32, #tpu.memory_space<vmem>>, vector<128x128xf32>
    %c772 = arith.constant 772 : index
    %c0_16 = arith.constant 0 : index
    %45 = vector.load %arg1[%c772, %c0_16] : memref<776x256xf32, #tpu.memory_space<vmem>>, vector<1x128xf32>
    %c773 = arith.constant 773 : index
    %c0_17 = arith.constant 0 : index
    %46 = vector.load %arg1[%c773, %c0_17] : memref<776x256xf32, #tpu.memory_space<vmem>>, vector<1x128xf32>
    %cst_18 = arith.constant dense<0.000000e+00> : vector<128xf32>
    %47 = vector.multi_reduction <add>, %43, %cst_18 [0] : vector<2x128xf32> to vector<128xf32>
    %48 = vector.shape_cast %47 : vector<128xf32> to vector<1x128xf32>
    %49 = arith.mulf %43, %43 : vector<2x128xf32>
    %cst_19 = arith.constant dense<0.000000e+00> : vector<128xf32>
    %50 = vector.multi_reduction <add>, %49, %cst_19 [0] : vector<2x128xf32> to vector<128xf32>
    %51 = vector.shape_cast %50 : vector<128xf32> to vector<1x128xf32>
    %52 = tpu.iota {dimensions = array<i32: 0>} : vector<2x128xi32>
    %c0_i32_20 = arith.constant 0 : i32
    %53 = vector.broadcast %c0_i32_20 : i32 to vector<2x128xi32>
    %54 = arith.cmpi eq, %52, %53 : vector<2x128xi32>
    %55 = vector.shape_cast %48 : vector<1x128xf32> to vector<1x128xf32>
    %56 = vector.broadcast %55 : vector<1x128xf32> to vector<2x128xf32>
    %57 = vector.shape_cast %51 : vector<1x128xf32> to vector<1x128xf32>
    %58 = vector.broadcast %57 : vector<1x128xf32> to vector<2x128xf32>
    %59 = arith.select %54, %56, %58 : vector<2x128xi1>, vector<2x128xf32>
    %cst_21 = arith.constant dense<0.000000e+00> : vector<2x128xf32>
    %60 = tpu.matmul %59, %44, %cst_21 {dimension_numbers = #tpu.dot_dimension_numbers<[1], [0], [0], [1], [0, 0, 1, 1], [], []>} : vector<2x128xf32>, vector<128x128xf32>, vector<2x128xf32> -> vector<2x128xf32>
    %61 = vector.extract_strided_slice %60 {offsets = [0, 0], sizes = [1, 128], strides = [1, 1]} : vector<2x128xf32> to vector<1x128xf32>
    %62 = vector.extract_strided_slice %60 {offsets = [1, 0], sizes = [1, 128], strides = [1, 1]} : vector<2x128xf32> to vector<1x128xf32>
    %63 = arith.mulf %61, %61 : vector<1x128xf32>
    %64 = arith.subf %62, %63 : vector<1x128xf32>
    %cst_22 = arith.constant 0.000000e+00 : f32
    %65 = vector.broadcast %cst_22 : f32 to vector<1x128xf32>
    %66 = arith.maximumf %64, %65 : vector<1x128xf32>
    %cst_23 = arith.constant 9.99999974E-6 : f32
    %67 = vector.broadcast %cst_23 : f32 to vector<1x128xf32>
    %68 = arith.addf %66, %67 : vector<1x128xf32>
    %69 = math.rsqrt %68 : vector<1x128xf32>
    %70 = arith.mulf %45, %69 : vector<1x128xf32>
    %71 = vector.broadcast %61 : vector<1x128xf32> to vector<2x128xf32>
    %72 = arith.subf %43, %71 : vector<2x128xf32>
    %73 = vector.broadcast %70 : vector<1x128xf32> to vector<2x128xf32>
    %74 = arith.mulf %72, %73 : vector<2x128xf32>
    %75 = vector.broadcast %46 : vector<1x128xf32> to vector<2x128xf32>
    %76 = arith.addf %74, %75 : vector<2x128xf32>
    %c640 = arith.constant 640 : index
    %c128_24 = arith.constant 128 : index
    %77 = vector.load %arg1[%c640, %c128_24] : memref<776x256xf32, #tpu.memory_space<vmem>>, vector<128x128xf32>
    %cst_25 = arith.constant dense<0.000000e+00> : vector<2x128xf32>
    %78 = tpu.matmul %76, %77, %cst_25 {dimension_numbers = #tpu.dot_dimension_numbers<[1], [0], [0], [1], [0, 0, 1, 1], [], []>} : vector<2x128xf32>, vector<128x128xf32>, vector<2x128xf32> -> vector<2x128xf32>
    %c774 = arith.constant 774 : index
    %c0_26 = arith.constant 0 : index
    %79 = vector.load %arg1[%c774, %c0_26] : memref<776x256xf32, #tpu.memory_space<vmem>>, vector<1x128xf32>
    %80 = vector.broadcast %79 : vector<1x128xf32> to vector<2x128xf32>
    %81 = arith.addf %78, %80 : vector<2x128xf32>
    %82 = vector.extract_strided_slice %81 {offsets = [0, 0], sizes = [2, 8], strides = [1, 1]} : vector<2x128xf32> to vector<2x8xf32>
    %c0_27 = arith.constant 0 : index
    %c0_28 = arith.constant 0 : index
    %83 = vector.load %arg2[%c0_27, %c0_28] : memref<2x8xf32, #tpu.memory_space<vmem>>, vector<2x8xf32>
    tpu.vector_store %arg2[%c0_27, %c0_28], %82 {strides = array<i32>} : memref<2x8xf32, #tpu.memory_space<vmem>>, vector<2x8xf32>,
    return
  }
}

</mosaic_0001>

<bundles_post_ra>
// kernel: forward.1
= control target key start
LH: loop header
LB: loop body
LE: loop exit
PB: predicated region body
PF: predicated region fallthrough
CT: control target
= control target key end

     0   :  { %7 = vsyncpa [#allocation3], 0  ;;  %s1081_s0 = inlined_call_operand.vmem [shape: f32[2,256], index: 0, kind: input, shape index: {}]   ;;  %s1082_s1 = inlined_call_operand.hbm [shape: f32[776,256], index: 1, kind: input, shape index: {}]   ;;  %s1083_s2 = inlined_call_operand.hbm [shape: f32[2,8], index: 2, kind: output, shape index: {}]  }
   0x1   :  { %8 = vsyncpa [#allocation4], 0  ;;  %s961_s9 = smov [#allocation2]  }
   0x2   :  { %s16_s10 = sshll.u32 %s961_s9, 4  ;;  %s17_s10 = int_to_ptr.vmem [resolvable:$true] %s16_s10 }
   0x3   :  { %s925_s11 = scalar_lea.vmem %s17_s10, 24832  ;;  %p930_p1 = scmp.lt.s32.totalorder %s17_s10, %s17_s10 }
   0x4   :  { %p926_p0 = scmp.ne.s32.totalorder %s17_s10, %s925_s11  ;;  %p931_p2 = scmp.lt.s32.totalorder %s925_s11, %s925_s11 }
   0x6   :  { %p932_p3 = por %p931_p2, %p930_p1 }
   0x8   :  { %p933_p4 = pnand %p932_p3, %p926_p0 }
   0xa   :  { %936 = shalt.err (!%p933_p4)
}
   0xb   :  { %s962_s12 = smov 256   ;;  %s963_s13 = smov 16  }
   0xc   :  { %22 = dma.hbm_to_vmem [thread:$0]  %s1082_s1, 24832, %s17_s10, [#allocation3], %s962_s12, %s962_s12, %s963_s13  }
   0xd   :  { %957 = dma.done.wait [#allocation3], 24832  }
   0xe   :  { %958 = vsyncadd [#allocation3], 4294942464  ;;  %v58_v0 = vld [vmem:[#allocation2 + $0xf8] sm:$0xff]  ;;  %v57_v1 = vld [vmem:[#allocation2 + $0xf0] sm:$0xff]  ;;  %vm254_vm0 = vcmask 1041408   ;;  %vm966_vm2 = vmmov 0  }
   0xf   :  { %v56_v2 = vld [vmem:[#allocation2 + $0xe8] sm:$0xff]  ;;  %115 = vmatprep.subr.mxu0 %v58_v0  ;;  %v55_v3 = vld [vmem:[#allocation2 + $0xe0] sm:$0xff]  ;;  %v54_v4 = vld [vmem:[#allocation2 + $0xd8] sm:$0xff]  ;;  %vm747_vm3 = vcmask 58368  }
  0x10   :  { %116 = vmatpush1.msra.mxu0 %v57_v1  ;;  %v53_v5 = vld [vmem:[#allocation2 + $0xd0] sm:$0xff]  ;;  %v52_v6 = vld [vmem:[#allocation2 + $0xc8] sm:$0xff]  ;;  %v51_v7 = vld [vmem:[#allocation2 + $0xc0] sm:$0xff] }
  0x11   :  { %117 = vmatprep.subr.mxu0 %v56_v2  ;;  %v50_v8 = vld [vmem:[#allocation2 + $0xb8] sm:$0xff]  ;;  %v49_v9 = vld [vmem:[#allocation2 + $0xb0] sm:$0xff]  ;;  %v48_v10 = vld [vmem:[#allocation2 + $0xa8] sm:$0xff] }
  0x12   :  { %118 = vmatpush1.msra.mxu0 %v55_v3  ;;  %v47_v11 = vld [vmem:[#allocation2 + $0xa0] sm:$0xff]  ;;  %v46_v12 = vld [vmem:[#allocation2 + $0x98] sm:$0xff]  ;;  %v45_v13 = vld [vmem:[#allocation2 + $0x90] sm:$0xff] }
  0x13   :  { %119 = vmatprep.subr.mxu0 %v54_v4  ;;  %v44_v14 = vld [vmem:[#allocation2 + $0x88] sm:$0xff]  ;;  %v43_v15 = vld [vmem:[#allocation2 + $0x80] sm:$0xff]  ;;  %v42_v16 = vld [vmem:[#allocation2 + $0x78] sm:$0xff] }
  0x14   :  { %120 = vmatpush1.msra.mxu0 %v53_v5  ;;  %v41_v17 = vld [vmem:[#allocation2 + $0x70] sm:$0xff]  ;;  %v40_v18 = vld [vmem:[#allocation2 + $0x68] sm:$0xff]  ;;  %v39_v19 = vld [vmem:[#allocation2 + $0x60] sm:$0xff] }
  0x15   :  { %121 = vmatprep.subr.mxu0 %v52_v6  ;;  %v38_v20 = vld [vmem:[#allocation2 + $0x58] sm:$0xff]  ;;  %v37_v21 = vld [vmem:[#allocation2 + $0x50] sm:$0xff]  ;;  %v36_v22 = vld [vmem:[#allocation2 + $0x48] sm:$0xff] }
  0x16   :  { %122 = vmatpush1.msra.mxu0 %v51_v7  ;;  %v35_v23 = vld [vmem:[#allocation2 + $0x40] sm:$0xff]  ;;  %v217_v25 = vld [vmem:[#allocation2 + $0x2f8] sm:$0xff]  ;;  %v216_v28 = vld [vmem:[#allocation2 + $0x2f0] sm:$0xff] }
  0x17   :  { %123 = vmatprep.subr.mxu0 %v50_v8  ;;  %v989_v24 = vld.sshfl [vmem:[%s1081_s0] sm:$0x33 pattern:$0x76325410]  ;;  %v34_v26 = vld [vmem:[#allocation2 + $0x38] sm:$0xff]  ;;  %290 = vmatprep.subr.mxu1 %v217_v25  ;;  %v215_v29 = vld [vmem:[#allocation2 + $0x2e8] sm:$0xff] }
  0x18   :  { %124 = vmatpush1.msra.mxu0 %v49_v9  ;;  %v112_v27 = vcombine.high %v989_v24, %v989_v24  ;;  %v33_v30 = vld [vmem:[#allocation2 + $0x30] sm:$0xff]  ;;  %291 = vmatpush1.msra.mxu1 %v216_v28  ;;  %v214_v31 = vld [vmem:[#allocation2 + $0x2e0] sm:$0xff]  ;;  %v32_v32 = vld [vmem:[#allocation2 + $0x28] sm:$0xff]  ;;  %s967_s0 = smov [#allocation5]  }
  0x19   :  { %125 = vmatprep.subr.mxu0 %v48_v10  ;;  %v213_v33 = vld [vmem:[#allocation2 + $0x2d8] sm:$0xff]  ;;  %v31_v34 = vld [vmem:[#allocation2 + $0x20] sm:$0xff]  ;;  %292 = vmatprep.subr.mxu1 %v215_v29  ;;  %v212_v35 = vld [vmem:[#allocation2 + $0x2d0] sm:$0xff]  ;;  %s755_s17 = sshll.u32 %s967_s0, 4  ;;  %s756_s17 = int_to_ptr.vmem [resolvable:$true] %s755_s17 }
  0x1a   :  { %126 = vmatpush1.msra.mxu0 %v47_v11  ;;  %179 = vmatprep.mubr.f32.mxu0 %v112_v27  ;;  %v30_v36 = vld [vmem:[#allocation2 + $0x18] sm:$0xff]  ;;  %v211_v37 = vld [vmem:[#allocation2 + $0x2c8] sm:$0xff]  ;;  %v29_v38 = vld [vmem:[#allocation2 + $0x10] sm:$0xff]  ;;  %s937_s18 = scalar_lea.vmem %s756_s17, 32  ;;  %p942_p6 = scmp.lt.s32.totalorder %s756_s17, %s756_s17 }
  0x1b   :  { %127 = vmatprep.subr.mxu0 %v46_v12  ;;  %293 = vmatpush1.msra.mxu1 %v214_v31  ;;  %v210_v39 = vld [vmem:[#allocation2 + $0x2c0] sm:$0xff]  ;;  %v28_v40 = vld [vmem:[#allocation2 + $0x8] sm:$0xff]  ;;  %v209_v41 = vld [vmem:[#allocation2 + $0x2b8] sm:$0xff]  ;;  %p938_p5 = scmp.ne.s32.totalorder %s756_s17, %s937_s18  ;;  %p943_p7 = scmp.lt.s32.totalorder %s937_s18, %s937_s18 }
  0x1c   :  { %128 = vmatpush1.msra.mxu0 %v45_v13  ;;  %294 = vmatprep.subr.mxu1 %v213_v33  ;;  %v27_v42 = vld [vmem:[#allocation2] sm:$0xff]  ;;  %v208_v43 = vld [vmem:[#allocation2 + $0x2b0] sm:$0xff]  ;;  %v90_v44 = vld [vmem:[#allocation2 + $0x1f8] sm:$0xff] }
  0x1d   :  { %129 = vmatprep.subr.mxu0 %v44_v14  ;;  %295 = vmatpush1.msra.mxu1 %v212_v35  ;;  %v207_v45 = vld [vmem:[#allocation2 + $0x2a8] sm:$0xff]  ;;  %v89_v46 = vld [vmem:[#allocation2 + $0x1f0] sm:$0xff]  ;;  %v206_v47 = vld [vmem:[#allocation2 + $0x2a0] sm:$0xff]  ;;  %p944_p8 = por %p943_p7, %p942_p6 }
  0x1e   :  { %130 = vmatpush1.msra.mxu0 %v43_v15  ;;  %296 = vmatprep.subr.mxu1 %v211_v37  ;;  %v88_v48 = vld [vmem:[#allocation2 + $0x1e8] sm:$0xff]  ;;  %v205_v49 = vld [vmem:[#allocation2 + $0x298] sm:$0xff]  ;;  %v87_v50 = vld [vmem:[#allocation2 + $0x1e0] sm:$0xff] }
  0x1f   :  { %131 = vmatprep.subr.mxu0 %v42_v16  ;;  %297 = vmatpush1.msra.mxu1 %v210_v39  ;;  %v204_v51 = vld [vmem:[#allocation2 + $0x290] sm:$0xff]  ;;  %v86_v52 = vld [vmem:[#allocation2 + $0x1d8] sm:$0xff]  ;;  %v203_v53 = vld [vmem:[#allocation2 + $0x288] sm:$0xff]  ;;  %p945_p9 = pnand %p944_p8, %p938_p5 }
  0x20   :  { %132 = vmatpush1.msra.mxu0 %v41_v17  ;;  %298 = vmatprep.subr.mxu1 %v209_v41  ;;  %v85_v54 = vld [vmem:[#allocation2 + $0x1d0] sm:$0xff]  ;;  %v202_v55 = vld [vmem:[#allocation2 + $0x280] sm:$0xff]  ;;  %v84_v56 = vld [vmem:[#allocation2 + $0x1c8] sm:$0xff] }
  0x21   :  { %133 = vmatprep.subr.mxu0 %v40_v18  ;;  %299 = vmatpush1.msra.mxu1 %v208_v43  ;;  %v201_v57 = vld [vmem:[#allocation2 + $0x278] sm:$0xff]  ;;  %v83_v58 = vld [vmem:[#allocation2 + $0x1c0] sm:$0xff]  ;;  %v200_v59 = vld [vmem:[#allocation2 + $0x270] sm:$0xff] }
  0x22   :  { %134 = vmatpush1.msra.mxu0 %v39_v19  ;;  %300 = vmatprep.subr.mxu1 %v207_v45  ;;  %v82_v60 = vld [vmem:[#allocation2 + $0x1b8] sm:$0xff]  ;;  %v199_v61 = vld [vmem:[#allocation2 + $0x268] sm:$0xff]  ;;  %v81_v62 = vld [vmem:[#allocation2 + $0x1b0] sm:$0xff] }
  0x23   :  { %135 = vmatprep.subr.mxu0 %v38_v20  ;;  %301 = vmatpush1.msra.mxu1 %v206_v47  ;;  %v198_v63 = vld [vmem:[#allocation2 + $0x260] sm:$0xff]  ;;  %v80_v0 = vld [vmem:[#allocation2 + $0x1a8] sm:$0xff]  ;;  %v197_v1 = vld [vmem:[#allocation2 + $0x258] sm:$0xff] }
  0x24   :  { %136 = vmatpush1.msra.mxu0 %v37_v21  ;;  %302 = vmatprep.subr.mxu1 %v205_v49  ;;  %v79_v2 = vld [vmem:[#allocation2 + $0x1a0] sm:$0xff]  ;;  %v196_v3 = vld [vmem:[#allocation2 + $0x250] sm:$0xff]  ;;  %v78_v4 = vld [vmem:[#allocation2 + $0x198] sm:$0xff] }
  0x25   :  { %137 = vmatprep.subr.mxu0 %v36_v22  ;;  %303 = vmatpush1.msra.mxu1 %v204_v51  ;;  %v195_v5 = vld [vmem:[#allocation2 + $0x248] sm:$0xff]  ;;  %v77_v6 = vld [vmem:[#allocation2 + $0x190] sm:$0xff]  ;;  %v194_v7 = vld [vmem:[#allocation2 + $0x240] sm:$0xff] }
  0x26   :  { %138 = vmatpush1.msra.mxu0 %v35_v23  ;;  %304 = vmatprep.subr.mxu1 %v203_v53  ;;  %v76_v8 = vld [vmem:[#allocation2 + $0x188] sm:$0xff]  ;;  %v193_v9 = vld [vmem:[#allocation2 + $0x238] sm:$0xff]  ;;  %v75_v10 = vld [vmem:[#allocation2 + $0x180] sm:$0xff] }
  0x27   :  { %139 = vmatprep.subr.mxu0 %v34_v26  ;;  %305 = vmatpush1.msra.mxu1 %v202_v55  ;;  %v192_v11 = vld [vmem:[#allocation2 + $0x230] sm:$0xff]  ;;  %v74_v12 = vld [vmem:[#allocation2 + $0x178] sm:$0xff]  ;;  %v191_v13 = vld [vmem:[#allocation2 + $0x228] sm:$0xff] }
  0x28   :  { %140 = vmatpush1.msra.mxu0 %v33_v30  ;;  %306 = vmatprep.subr.mxu1 %v201_v57  ;;  %v73_v14 = vld [vmem:[#allocation2 + $0x170] sm:$0xff]  ;;  %v190_v15 = vld [vmem:[#allocation2 + $0x220] sm:$0xff]  ;;  %v72_v16 = vld [vmem:[#allocation2 + $0x168] sm:$0xff] }
  0x29   :  { %141 = vmatprep.subr.mxu0 %v32_v32  ;;  %307 = vmatpush1.msra.mxu1 %v200_v59  ;;  %v189_v17 = vld [vmem:[#allocation2 + $0x218] sm:$0xff]  ;;  %v71_v18 = vld [vmem:[#allocation2 + $0x160] sm:$0xff]  ;;  %v188_v19 = vld [vmem:[#allocation2 + $0x210] sm:$0xff] }
  0x2a   :  { %142 = vmatpush1.msra.mxu0 %v31_v34  ;;  %308 = vmatprep.subr.mxu1 %v199_v61  ;;  %v70_v20 = vld [vmem:[#allocation2 + $0x158] sm:$0xff]  ;;  %v187_v21 = vld [vmem:[#allocation2 + $0x208] sm:$0xff]  ;;  %v69_v22 = vld [vmem:[#allocation2 + $0x150] sm:$0xff] }
  0x2b   :  { %143 = vmatprep.subr.mxu0 %v30_v36  ;;  %309 = vmatpush1.msra.mxu1 %v198_v63  ;;  %v186_v23 = vld [vmem:[#allocation2 + $0x200] sm:$0xff]  ;;  %v68_v25 = vld [vmem:[#allocation2 + $0x148] sm:$0xff]  ;;  %v249_v26 = vld [vmem:[#allocation2 + $0x3f8] sm:$0xff] }
  0x2c   :  { %144 = vmatpush1.msra.mxu0 %v29_v38  ;;  %310 = vmatprep.subr.mxu1 %v197_v1  ;;  %v67_v27 = vld [vmem:[#allocation2 + $0x140] sm:$0xff]  ;;  %v248_v28 = vld [vmem:[#allocation2 + $0x3f0] sm:$0xff]  ;;  %v66_v29 = vld [vmem:[#allocation2 + $0x138] sm:$0xff] }
  0x2d   :  { %145 = vmatprep.subr.mxu0 %v28_v40  ;;  %311 = vmatpush1.msra.mxu1 %v196_v3  ;;  %v247_v30 = vld [vmem:[#allocation2 + $0x3e8] sm:$0xff]  ;;  %v65_v31 = vld [vmem:[#allocation2 + $0x130] sm:$0xff]  ;;  %v246_v32 = vld [vmem:[#allocation2 + $0x3e0] sm:$0xff] }
  0x2e   :  { %146 = vmatpush1.msra.mxu0 %v27_v42  ;;  %312 = vmatprep.subr.mxu1 %v195_v5  ;;  %v64_v33 = vld [vmem:[#allocation2 + $0x128] sm:$0xff]  ;;  %v245_v34 = vld [vmem:[#allocation2 + $0x3d8] sm:$0xff]  ;;  %v63_v35 = vld [vmem:[#allocation2 + $0x120] sm:$0xff] }
  0x2f   :  { %147 = vmatprep.subr.mxu0 %v90_v44  ;;  %313 = vmatpush1.msra.mxu1 %v194_v7  ;;  %v244_v36 = vld [vmem:[#allocation2 + $0x3d0] sm:$0xff]  ;;  %v62_v37 = vld [vmem:[#allocation2 + $0x118] sm:$0xff]  ;;  %v243_v38 = vld [vmem:[#allocation2 + $0x3c8] sm:$0xff] }
  0x30   :  { %148 = vmatpush2.msra.mxu0 %v89_v46  ;;  %314 = vmatprep.subr.mxu1 %v193_v9  ;;  %v61_v39 = vld [vmem:[#allocation2 + $0x110] sm:$0xff]  ;;  %v242_v40 = vld [vmem:[#allocation2 + $0x3c0] sm:$0xff]  ;;  %v60_v41 = vld [vmem:[#allocation2 + $0x108] sm:$0xff] }
  0x31   :  { %149 = vmatprep.subr.mxu0 %v88_v48  ;;  %315 = vmatpush1.msra.mxu1 %v192_v11  ;;  %v241_v42 = vld [vmem:[#allocation2 + $0x3b8] sm:$0xff]  ;;  %v59_v43 = vld [vmem:[#allocation2 + $0x100] sm:$0xff]  ;;  %v240_v44 = vld [vmem:[#allocation2 + $0x3b0] sm:$0xff] }
  0x32   :  { %150 = vmatpush2.msra.mxu0 %v87_v50  ;;  %316 = vmatprep.subr.mxu1 %v191_v13  ;;  %v239_v45 = vld [vmem:[#allocation2 + $0x3a8] sm:$0xff]  ;;  %v238_v46 = vld [vmem:[#allocation2 + $0x3a0] sm:$0xff]  ;;  %v237_v47 = vld [vmem:[#allocation2 + $0x398] sm:$0xff] }
  0x33   :  { %151 = vmatprep.subr.mxu0 %v86_v52  ;;  %317 = vmatpush1.msra.mxu1 %v190_v15  ;;  %v236_v48 = vld [vmem:[#allocation2 + $0x390] sm:$0xff]  ;;  %v235_v49 = vld [vmem:[#allocation2 + $0x388] sm:$0xff]  ;;  %v234_v50 = vld [vmem:[#allocation2 + $0x380] sm:$0xff] }
  0x34   :  { %152 = vmatpush2.msra.mxu0 %v85_v54  ;;  %318 = vmatprep.subr.mxu1 %v189_v17  ;;  %v233_v51 = vld [vmem:[#allocation2 + $0x378] sm:$0xff]  ;;  %v232_v52 = vld [vmem:[#allocation2 + $0x370] sm:$0xff]  ;;  %v231_v53 = vld [vmem:[#allocation2 + $0x368] sm:$0xff] }
  0x35   :  { %153 = vmatprep.subr.mxu0 %v84_v56  ;;  %319 = vmatpush1.msra.mxu1 %v188_v19  ;;  %v230_v54 = vld [vmem:[#allocation2 + $0x360] sm:$0xff]  ;;  %v228_v55 = vld [vmem:[#allocation2 + $0x350] sm:$0xff]  ;;  %v227_v56 = vld [vmem:[#allocation2 + $0x348] sm:$0xff] }
  0x36   :  { %154 = vmatpush2.msra.mxu0 %v83_v58  ;;  %320 = vmatprep.subr.mxu1 %v187_v21  ;;  %v226_v57 = vld [vmem:[#allocation2 + $0x340] sm:$0xff]  ;;  %v225_v58 = vld [vmem:[#allocation2 + $0x338] sm:$0xff]  ;;  %v224_v59 = vld [vmem:[#allocation2 + $0x330] sm:$0xff] }
  0x37   :  { %155 = vmatprep.subr.mxu0 %v82_v60  ;;  %321 = vmatpush1.msra.mxu1 %v186_v23  ;;  %v223_v60 = vld [vmem:[#allocation2 + $0x328] sm:$0xff]  ;;  %v222_v61 = vld [vmem:[#allocation2 + $0x320] sm:$0xff]  ;;  %v220_v63 = vld [vmem:[#allocation2 + $0x310] sm:$0xff] }
  0x38   :  { %156 = vmatpush2.msra.mxu0 %v81_v62  ;;  %322 = vmatprep.subr.mxu1 %v249_v26  ;;  %v221_v62 = vld [vmem:[#allocation2 + $0x318] sm:$0xff]  ;;  %v218_v1 = vld [vmem:[#allocation2 + $0x300] sm:$0xff] }
  0x39   :  { %157 = vmatprep.subr.mxu0 %v80_v0  ;;  %323 = vmatpush2.msra.mxu1 %v248_v28  ;;  %v219_v0 = vld [vmem:[#allocation2 + $0x308] sm:$0xff] }
  0x3a   :  { %158 = vmatpush2.msra.mxu0 %v79_v2  ;;  %324 = vmatprep.subr.mxu1 %v247_v30  ;;  %v94_v2 = vlaneseq  ;;  %v92_v5 = vld [vmem:[#allocation2 + $0x600] ss:$8 sm:$0x3] }
  0x3b   :  { %159 = vmatprep.subr.mxu0 %v78_v4  ;;  %325 = vmatpush2.msra.mxu1 %v246_v32 }
  0x3c   :  { %160 = vmatpush2.msra.mxu0 %v77_v6  ;;  %326 = vmatprep.subr.mxu1 %v245_v34  ;;  %v994_v3 = vshrl.u32 %v94_v2, 7  ;;  %v438_v2 = vld [vmem:[#allocation2 + $0x450] sm:$0xff] }
  0x3d   :  { %161 = vmatprep.subr.mxu0 %v76_v8  ;;  %327 = vmatpush2.msra.mxu1 %v244_v36 }
  0x3e   :  { %162 = vmatpush2.msra.mxu0 %v75_v10  ;;  %328 = vmatprep.subr.mxu1 %v243_v38  ;;  %v997_v4 = vsub.s32 0, %v994_v3  ;;  %v1000_v6 = vsub.s32 1, %v994_v3  ;;  %vm287_vm1 = vcmp.eq.s32.totalorder %v994_v3, 0 }
  0x3f   :  { %163 = vmatprep.subr.mxu0 %v74_v12  ;;  %329 = vmatpush2.msra.mxu1 %v242_v40 }
  0x40   :  { %164 = vmatpush2.msra.mxu0 %v73_v14  ;;  %330 = vmatprep.subr.mxu1 %v241_v42  ;;  %v97_v7 = vrot.slane %v92_v5, %v997_v4  ;;  %v101_v8 = vrot.slane %v92_v5, %v1000_v6  ;;  %v453_v5 = vld [vmem:[#allocation2 + $0x540] sm:$0xff] }
  0x41   :  { %165 = vmatprep.subr.mxu0 %v72_v16  ;;  %331 = vmatpush2.msra.mxu1 %v240_v44 }
  0x42   :  { %166 = vmatpush2.msra.mxu0 %v71_v18  ;;  %332 = vmatprep.subr.mxu1 %v239_v45 }
  0x43   :  { %167 = vmatprep.subr.mxu0 %v70_v20  ;;  %333 = vmatpush2.msra.mxu1 %v238_v46  ;;  %v464_v46 = vld [vmem:[#allocation2 + $0x5f0] sm:$0xff] }
  0x44   :  { %168 = vmatpush2.msra.mxu0 %v69_v22  ;;  %334 = vmatprep.subr.mxu1 %v237_v47  ;;  %v448_v47 = vld [vmem:[#allocation2 + $0x4f0] sm:$0xff] }
  0x45   :  { %169 = vmatprep.subr.mxu0 %v68_v25  ;;  %335 = vmatpush2.msra.mxu1 %v236_v48  ;;  %v463_v48 = vld [vmem:[#allocation2 + $0x5e0] sm:$0xff] }
  0x46   :  { %170 = vmatpush2.msra.mxu0 %v67_v27  ;;  %336 = vmatprep.subr.mxu1 %v235_v49  ;;  %v447_v49 = vld [vmem:[#allocation2 + $0x4e0] sm:$0xff] }
  0x47   :  { %171 = vmatprep.subr.mxu0 %v66_v29  ;;  %337 = vmatpush2.msra.mxu1 %v234_v50  ;;  %v462_v50 = vld [vmem:[#allocation2 + $0x5d0] sm:$0xff] }
  0x48   :  { %172 = vmatpush2.msra.mxu0 %v65_v31  ;;  %338 = vmatprep.subr.mxu1 %v233_v51  ;;  %v446_v51 = vld [vmem:[#allocation2 + $0x4d0] sm:$0xff] }
  0x49   :  { %173 = vmatprep.subr.mxu0 %v64_v33  ;;  %339 = vmatpush2.msra.mxu1 %v232_v52  ;;  %v461_v52 = vld [vmem:[#allocation2 + $0x5c0] sm:$0xff] }
  0x4a   :  { %174 = vmatpush2.msra.mxu0 %v63_v35  ;;  %340 = vmatprep.subr.mxu1 %v231_v53  ;;  %v445_v53 = vld [vmem:[#allocation2 + $0x4c0] sm:$0xff] }
  0x4b   :  { %175 = vmatprep.subr.mxu0 %v62_v37  ;;  %341 = vmatpush2.msra.mxu1 %v230_v54  ;;  %v460_v54 = vld [vmem:[#allocation2 + $0x5b0] sm:$0xff] }
  0x4c   :  { %176 = vmatpush2.msra.mxu0 %v61_v39 }
  0x4d   :  { %177 = vmatprep.subr.mxu0 %v60_v41 }
  0x4e   :  { %178 = vmatpush2.msra.mxu0 %v59_v43 }
  0x4f   :  { %180 = vmatmul.mubr.f32.vlgmr.msra.gmra.mxu0 %v989_v24  ;;  %v229_v24 = vld [vmem:[#allocation2 + $0x358] sm:$0xff]  ;;  %765 = vmatprep.subr.mxu0 %v464_v46 }
  0x50   :  { %342 = vmatprep.subr.mxu1 %v229_v24  ;;  %766 = vmatpush3.msra.mxu0 %v448_v47  ;;  %v444_v24 = vld [vmem:[#allocation2 + $0x4b0] sm:$0xff] }
  0x51   :  { %343 = vmatpush2.msra.mxu1 %v228_v55  ;;  %767 = vmatprep.subr.mxu0 %v463_v48  ;;  %v459_v55 = vld [vmem:[#allocation2 + $0x5a0] sm:$0xff] }
  0x52   :  { %344 = vmatprep.subr.mxu1 %v227_v56  ;;  %768 = vmatpush3.msra.mxu0 %v447_v49  ;;  %v443_v56 = vld [vmem:[#allocation2 + $0x4a0] sm:$0xff] }
  0x53   :  { %345 = vmatpush2.msra.mxu1 %v226_v57  ;;  %769 = vmatprep.subr.mxu0 %v462_v50  ;;  %v458_v57 = vld [vmem:[#allocation2 + $0x590] sm:$0xff]  ;;  %v253_v48 = vld [vmem:[#allocation2 + $0x602] ss:$8 sm:$0x3] }
  0x54   :  { %346 = vmatprep.subr.mxu1 %v225_v58  ;;  %770 = vmatpush3.msra.mxu0 %v446_v51  ;;  %v442_v58 = vld [vmem:[#allocation2 + $0x490] sm:$0xff]  ;;  %v424_v51 = vrot.slane %v253_v48, %v997_v4 }
  0x55   :  { %347 = vmatpush2.msra.mxu1 %v224_v59  ;;  %771 = vmatprep.subr.mxu0 %v461_v52  ;;  %v457_v59 = vld [vmem:[#allocation2 + $0x580] sm:$0xff]  ;;  %v428_v52 = vrot.slane %v253_v48, %v1000_v6  ;;  %v660_v48 = vld [vmem:[#allocation2 + $0x508] sm:$0xff] }
  0x56   :  { %348 = vmatprep.subr.mxu1 %v223_v60  ;;  %772 = vmatpush3.msra.mxu0 %v445_v53  ;;  %v441_v60 = vld [vmem:[#allocation2 + $0x480] sm:$0xff] }
  0x57   :  { %349 = vmatpush2.msra.mxu1 %v222_v61  ;;  %773 = vmatprep.subr.mxu0 %v460_v54  ;;  %v456_v61 = vld [vmem:[#allocation2 + $0x570] sm:$0xff] }
  0x58   :  { %350 = vmatprep.subr.mxu1 %v221_v62  ;;  %774 = vmatpush3.msra.mxu0 %v444_v24  ;;  %v440_v62 = vld [vmem:[#allocation2 + $0x470] sm:$0xff] }
  0x59   :  { %351 = vmatpush2.msra.mxu1 %v220_v63  ;;  %775 = vmatprep.subr.mxu0 %v459_v55  ;;  %v455_v63 = vld [vmem:[#allocation2 + $0x560] sm:$0xff] }
  0x5a   :  { %352 = vmatprep.subr.mxu1 %v219_v0  ;;  %776 = vmatpush3.msra.mxu0 %v443_v56  ;;  %v439_v0 = vld [vmem:[#allocation2 + $0x460] sm:$0xff] }
  0x5b   :  { %353 = vmatpush2.msra.mxu1 %v218_v1  ;;  %777 = vmatprep.subr.mxu0 %v458_v57  ;;  %v454_v1 = vld [vmem:[#allocation2 + $0x550] sm:$0xff] }
  0x5c   :  { %778 = vmatpush3.msra.mxu0 %v442_v58 }
  0x5d   :  { %779 = vmatprep.subr.mxu0 %v457_v59 }
  0x5e   :  { %780 = vmatpush3.msra.mxu0 %v441_v60  ;;  %v547_v60 = vld [vmem:[#allocation2 + $0x4b8] sm:$0xff] }
  0x5f   :  { %781 = vmatprep.subr.mxu0 %v456_v61  ;;  %v546_v61 = vld [vmem:[#allocation2 + $0x4a8] sm:$0xff] }
  0x60   :  { %782 = vmatpush3.msra.mxu0 %v440_v62  ;;  %v543_v62 = vld [vmem:[#allocation2 + $0x478] sm:$0xff] }
  0x61   :  { %783 = vmatprep.subr.mxu0 %v455_v63  ;;  %v542_v63 = vld [vmem:[#allocation2 + $0x468] sm:$0xff] }
  0x62   :  { %784 = vmatpush3.msra.mxu0 %v439_v0  ;;  %v541_v0 = vld [vmem:[#allocation2 + $0x458] sm:$0xff] }
  0x63   :  { %785 = vmatprep.subr.mxu0 %v454_v1  ;;  %v540_v1 = vld [vmem:[#allocation2 + $0x448] sm:$0xff] }
  0x64   :  { %786 = vmatpush3.msra.mxu0 %v438_v2  ;;  %v539_v2 = vld [vmem:[#allocation2 + $0x438] sm:$0xff] }
  0x65   :  { %787 = vmatprep.subr.mxu0 %v453_v5  ;;  %v538_v5 = vld [vmem:[#allocation2 + $0x428] sm:$0xff] }
 0x10f   :  { %v181_v9 = vpop.f32.mrf.mxu0 }
 0x110   :  { %v1004_v10 = vadd.f32 %v181_v9, %v97_v7  ;;  %v437_v7 = vld [vmem:[#allocation2 + $0x440] sm:$0xff]  ;;  %v436_v9 = vld [vmem:[#allocation2 + $0x430] sm:$0xff] }
 0x111   :  { %v183_v11 = vpop.f32.mrf.mxu0  ;;  %788 = vmatpush3.msra.mxu0 %v437_v7  ;;  %v537_v7 = vld [vmem:[#allocation2 + $0x418] sm:$0xff] }
 0x112   :  { %v255_v12 = vsel %vm254_vm0, %v1004_v10, 0.0  ;;  %v269_v13 = vmul.f32 %v1004_v10, %v1004_v10  ;;  %v1010_v14 = vadd.f32 %v183_v11, %v101_v8  ;;  %v452_v8 = vld [vmem:[#allocation2 + $0x530] sm:$0xff]  ;;  %v451_v11 = vld [vmem:[#allocation2 + $0x520] sm:$0xff] }
 0x113   :  { %v256_v15 = vrot.slane %v255_v12, 4  ;;  %789 = vmatprep.subr.mxu0 %v452_v8  ;;  %v536_v8 = vld [vmem:[#allocation2 + $0x408] sm:$0xff] }
 0x114   :  { %v271_v16 = vsel %vm254_vm0, %v269_v13, 0.0  ;;  %v262_v17 = vsel %vm254_vm0, %v1010_v14, 0.0  ;;  %v270_v18 = vmul.f32 %v1010_v14, %v1010_v14  ;;  %790 = vmatpush3.msra.mxu0 %v436_v9  ;;  %v450_v13 = vld [vmem:[#allocation2 + $0x510] sm:$0xff] }
 0x115   :  { %v257_v19 = vadd.f32 %v256_v15, %v255_v12  ;;  %v272_v20 = vrot.slane %v271_v16, 4  ;;  %v263_v21 = vrot.slane %v262_v17, 4  ;;  %v435_v12 = vld [vmem:[#allocation2 + $0x420] sm:$0xff]  ;;  %791 = vmatprep.subr.mxu0 %v451_v11  ;;  %v434_v15 = vld [vmem:[#allocation2 + $0x410] sm:$0xff] }
 0x116   :  { %v278_v22 = vsel %vm254_vm0, %v270_v18, 0.0  ;;  %792 = vmatpush3.msra.mxu0 %v435_v12  ;;  %v551_v18 = vld [vmem:[#allocation2 + $0x4f8] sm:$0xff]  ;;  %v465_v11 = vld [vmem:[#allocation2 + $0x603] ss:$0 sm:$0xff] }
 0x117   :  { %v258_v23 = vrot.slane %v257_v19, 2  ;;  %v273_v25 = vadd.f32 %v272_v20, %v271_v16  ;;  %v264_v26 = vadd.f32 %v263_v21, %v262_v17  ;;  %v279_v27 = vrot.slane %v278_v22, 4  ;;  %v449_v16 = vld [vmem:[#allocation2 + $0x500] sm:$0xff]  ;;  %793 = vmatprep.subr.mxu0 %v450_v13  ;;  %v550_v20 = vld [vmem:[#allocation2 + $0x4e8] sm:$0xff]  ;;  %v549_v21 = vld [vmem:[#allocation2 + $0x4d8] sm:$0xff] }
 0x118   :  { %v433_v17 = vld [vmem:[#allocation2 + $0x400] sm:$0xff]  ;;  %794 = vmatpush3.msra.mxu0 %v434_v15 }
 0x119   :  { %v274_v28 = vrot.slane %v273_v25, 2  ;;  %v265_v29 = vrot.slane %v264_v26, 2  ;;  %v280_v30 = vadd.f32 %v279_v27, %v278_v22  ;;  %v259_v31 = vadd.f32 %v258_v23, %v257_v19  ;;  %795 = vmatprep.subr.mxu0 %v449_v16  ;;  %v548_v22 = vld [vmem:[#allocation2 + $0x4c8] sm:$0xff] }
 0x11a   :  { %796 = vmatpush3.msra.mxu0 %v433_v17  ;;  %v964_v19 = vmov 0.0  }
 0x11b   :  { %v266_v32 = vadd.f32 %v265_v29, %v264_v26  ;;  %v281_v33 = vrot.slane %v280_v30, 2  ;;  %v275_v34 = vadd.f32 %v274_v28, %v273_v25  ;;  %v260_v38 = vrot.slane %v259_v31, 1  ;;  %834 = vmatprep.subr.mxu1 %v964_v19  ;;  %869 = vmatprep.subr.mxu0 %v964_v19 }
 0x11d   :  { %v267_v35 = vrot.slane %v266_v32, 1  ;;  %v282_v36 = vadd.f32 %v281_v33, %v280_v30  ;;  %v276_v37 = vrot.slane %v275_v34, 1  ;;  %v261_v43 = vadd.f32 %v260_v38, %v259_v31 }
 0x11f   :  { %v283_v39 = vrot.slane %v282_v36, 1  ;;  %v277_v40 = vadd.f32 %v276_v37, %v275_v34  ;;  %v268_v41 = vadd.f32 %v267_v35, %v266_v32 }
 0x121   :  { %v284_v42 = vadd.f32 %v283_v39, %v282_v36  ;;  %v288_v45 = vsel %vm287_vm1, %v261_v43, %v277_v40  ;;  %v965_v36 = vmov 1966171168  }
 0x122   :  { %v381_v37 = vunpack.c.l.s4 %v965_v36  ;;  %v673_v36 = vld [vmem:[#allocation2 + $0x5d8] sm:$0xff] }
 0x123   :  { %v289_v44 = vsel %vm287_vm1, %v268_v41, %v284_v42 }
 0x124   :  { %354 = vmatprep.mubr.f32.mxu1 %v289_v44  ;;  %v382_v38 = vunpack.c.0.s8 %v381_v37  ;;  %v672_v37 = vld [vmem:[#allocation2 + $0x5c8] sm:$0xff] }
 0x125   :  { %355 = vmatmul.mubr.f32.vlgmr.msra.gmra.mxu1 %v288_v45  ;;  %v251_v45 = vld [vmem:[#allocation2 + $0x601] ss:$8 sm:$0x3] }
 0x126   :  { %835 = vmatpush3.msra.mxu1 %v551_v18  ;;  %v385_v40 = vsub.s32 %v382_v38, %v994_v3  ;;  %866 = vmatprep.mubr.msk.f32.mxu1 %vm966_vm2, %v964_v19  ;;  %v671_v38 = vld [vmem:[#allocation2 + $0x5b8] sm:$0xff]  ;;  %v670_v3 = vld [vmem:[#allocation2 + $0x5a8] sm:$0xff] }
 0x127   :  { %836 = vmatprep.subr.mxu1 %v964_v19 }
 0x128   :  { %837 = vmatpush3.msra.mxu1 %v550_v20 }
 0x129   :  { %838 = vmatprep.subr.mxu1 %v964_v19 }
 0x12a   :  { %839 = vmatpush3.msra.mxu1 %v549_v21 }
 0x12b   :  { %840 = vmatprep.subr.mxu1 %v964_v19 }
 0x12c   :  { %841 = vmatpush3.msra.mxu1 %v548_v22 }
 0x12d   :  { %842 = vmatprep.subr.mxu1 %v964_v19 }
 0x12e   :  { %843 = vmatpush3.msra.mxu1 %v547_v60 }
 0x12f   :  { %844 = vmatprep.subr.mxu1 %v964_v19 }
 0x130   :  { %845 = vmatpush3.msra.mxu1 %v546_v61  ;;  %v553_v61 = vld [vmem:[#allocation2 + $0x605] ss:$0 sm:$0xff] }
 0x131   :  { %846 = vmatprep.subr.mxu1 %v964_v19 }
 0x1e5   :  { %v356_v23 = vpop.f32.mrf.mxu1 }
 0x1e6   :  { %v361_v25 = vmul.f32 %v356_v23, %v356_v23  ;;  %v400_v46 = vrot.slane %v356_v23, %v997_v4 }
 0x1e7   :  { %v358_v26 = vpop.f32.mrf.mxu1 }
 0x1e8   :  { %v365_v27 = vrot.slane %v361_v25, 7  ;;  %v362_v28 = vmul.f32 %v358_v26, %v358_v26  ;;  %v404_v47 = vrot.slane %v358_v26, %v997_v4  ;;  %v405_v53 = vsub.f32 %v1004_v10, %v400_v46  ;;  %v545_v10 = vld [vmem:[#allocation2 + $0x498] sm:$0xff]  ;;  %v662_v46 = vld [vmem:[#allocation2 + $0x528] sm:$0xff] }
 0x1e9   :  { %847 = vmatpush3.msra.mxu1 %v545_v10 }
 0x1ea   :  { %v369_v29 = vsub.f32 %v356_v23, %v365_v27  ;;  %v366_v30 = vrot.slane %v362_v28, 7  ;;  %v406_v54 = vsub.f32 %v1010_v14, %v404_v47  ;;  %848 = vmatprep.subr.mxu1 %v964_v19  ;;  %v544_v14 = vld [vmem:[#allocation2 + $0x488] sm:$0xff]  ;;  %v661_v47 = vld [vmem:[#allocation2 + $0x518] sm:$0xff] }
 0x1eb   :  { %849 = vmatpush3.msra.mxu1 %v544_v14  ;;  %v676_v14 = vld [vmem:[#allocation2 + $0x606] ss:$0 sm:$0xff] }
 0x1ec   :  { %v371_v31 = vmax.f32 %v369_v29, 0.0  ;;  %v370_v32 = vsub.f32 %v358_v26, %v366_v30  ;;  %850 = vmatprep.subr.mxu1 %v964_v19 }
 0x1ed   :  { %851 = vmatpush3.msra.mxu1 %v543_v62 }
 0x1ee   :  { %v373_v33 = vadd.f32 1e-05, %v371_v31  ;;  %v372_v34 = vmax.f32 %v370_v32, 0.0  ;;  %852 = vmatprep.subr.mxu1 %v964_v19 }
 0x1ef   :  { %853 = vmatpush3.msra.mxu1 %v542_v63 }
 0x1f0   :  { %v374_v35 = vadd.f32 1e-05, %v372_v34  ;;  %911 = vrsqrt.f32 %v373_v33  ;;  %854 = vmatprep.subr.mxu1 %v964_v19  ;;  %v675_v34 = vld [vmem:[#allocation2 + $0x5f8] sm:$0xff] }
 0x1f1   :  { %855 = vmatpush3.msra.mxu1 %v541_v0 }
 0x1f2   :  { %913 = vrsqrt.f32 %v374_v35  ;;  %856 = vmatprep.subr.mxu1 %v964_v19  ;;  %v674_v35 = vld [vmem:[#allocation2 + $0x5e8] sm:$0xff] }
 0x1f3   :  { %857 = vmatpush3.msra.mxu1 %v540_v1 }
 0x1f4   :  { %858 = vmatprep.subr.mxu1 %v964_v19 }
 0x1f5   :  { %859 = vmatpush3.msra.mxu1 %v539_v2 }
 0x1f6   :  { %860 = vmatprep.subr.mxu1 %v964_v19 }
 0x1f7   :  { %861 = vmatpush3.msra.mxu1 %v538_v5 }
 0x1f8   :  { %862 = vmatprep.subr.mxu1 %v964_v19 }
 0x1f9   :  { %863 = vmatpush3.msra.mxu1 %v537_v7 }
 0x1fa   :  { %864 = vmatprep.subr.mxu1 %v964_v19 }
 0x1fb   :  { %865 = vmatpush3.msra.mxu1 %v536_v8 }
 0x1fd   :  { %v912_v39 = vpop.eup %911 }
 0x1ff   :  { %v914_v41 = vpop.eup %913 }
 0x200   :  { %v379_v42 = vcombine.low %v912_v39, %v914_v41  ;;  %v669_v39 = vld [vmem:[#allocation2 + $0x598] sm:$0xff] }
 0x201   :  { %v667_v41 = vld [vmem:[#allocation2 + $0x578] sm:$0xff] }
 0x202   :  { %v386_v43 = vrot.slane %v379_v42, %v385_v40  ;;  %v666_v42 = vld [vmem:[#allocation2 + $0x568] sm:$0xff] }
 0x204   :  { %v387_v44 = vcombine.high %v386_v43, %v386_v43  ;;  %v665_v43 = vld [vmem:[#allocation2 + $0x558] sm:$0xff] }
 0x206   :  { %v394_v49 = vrot.slane %v387_v44, %v385_v40  ;;  %v668_v40 = vld [vmem:[#allocation2 + $0x588] sm:$0xff] }
 0x207   :  { %v664_v44 = vld [vmem:[#allocation2 + $0x548] sm:$0xff] }
 0x208   :  { %v396_v50 = vmul.f32 %v394_v49, %v251_v45  ;;  %v663_v45 = vld [vmem:[#allocation2 + $0x538] sm:$0xff] }
 0x20a   :  { %v415_v24 = vrot.slane %v396_v50, %v1000_v6  ;;  %v411_v55 = vrot.slane %v396_v50, %v997_v4 }
 0x20c   :  { %v419_v56 = vmul.f32 %v415_v24, %v406_v54  ;;  %v418_v57 = vmul.f32 %v411_v55, %v405_v53  ;;  %v552_v55 = vld [vmem:[#allocation2 + $0x604] ss:$0 sm:$0xff] }
 0x20e   :  { %v432_v58 = vadd.f32 %v428_v52, %v419_v56  ;;  %v431_v59 = vadd.f32 %v424_v51, %v418_v57 }
 0x210   :  { %530 = vmatprep.mubr.f32.mxu0 %v432_v58 }
 0x211   :  { %531 = vmatmul.mubr.f32.vlgmr.msra.gmra.mxu0 %v431_v59 }
 0x212   :  { %901 = vmatprep.mubr.msk.f32.mxu0 %vm966_vm2, %v964_v19  ;;  %870 = vmatpush3.msra.mxu0 %v675_v34 }
 0x213   :  { %871 = vmatprep.subr.mxu0 %v964_v19 }
 0x214   :  { %872 = vmatpush3.msra.mxu0 %v674_v35 }
 0x215   :  { %873 = vmatprep.subr.mxu0 %v964_v19 }
 0x216   :  { %874 = vmatpush3.msra.mxu0 %v673_v36 }
 0x217   :  { %875 = vmatprep.subr.mxu0 %v964_v19 }
 0x218   :  { %876 = vmatpush3.msra.mxu0 %v672_v37 }
 0x219   :  { %877 = vmatprep.subr.mxu0 %v964_v19 }
 0x21a   :  { %878 = vmatpush3.msra.mxu0 %v671_v38 }
 0x21b   :  { %879 = vmatprep.subr.mxu0 %v964_v19 }
 0x21c   :  { %880 = vmatpush3.msra.mxu0 %v670_v3 }
 0x21d   :  { %881 = vmatprep.subr.mxu0 %v964_v19 }
 0x21e   :  { %882 = vmatpush3.msra.mxu0 %v669_v39 }
 0x21f   :  { %883 = vmatprep.subr.mxu0 %v964_v19 }
 0x220   :  { %884 = vmatpush3.msra.mxu0 %v668_v40 }
 0x221   :  { %885 = vmatprep.subr.mxu0 %v964_v19 }
 0x222   :  { %886 = vmatpush3.msra.mxu0 %v667_v41 }
 0x223   :  { %887 = vmatprep.subr.mxu0 %v964_v19 }
 0x224   :  { %888 = vmatpush3.msra.mxu0 %v666_v42 }
 0x225   :  { %889 = vmatprep.subr.mxu0 %v964_v19 }
 0x226   :  { %890 = vmatpush3.msra.mxu0 %v665_v43 }
 0x227   :  { %891 = vmatprep.subr.mxu0 %v964_v19 }
 0x228   :  { %892 = vmatpush3.msra.mxu0 %v664_v44 }
 0x229   :  { %893 = vmatprep.subr.mxu0 %v964_v19 }
 0x22a   :  { %894 = vmatpush3.msra.mxu0 %v663_v45 }
 0x22b   :  { %895 = vmatprep.subr.mxu0 %v964_v19 }
 0x22c   :  { %896 = vmatpush3.msra.mxu0 %v662_v46 }
 0x22d   :  { %897 = vmatprep.subr.mxu0 %v964_v19 }
 0x22e   :  { %898 = vmatpush3.msra.mxu0 %v661_v47 }
 0x22f   :  { %899 = vmatprep.subr.mxu0 %v964_v19 }
 0x230   :  { %900 = vmatpush3.msra.mxu0 %v660_v48 }
 0x2d1   :  { %v797_v9 = vpop.f32.mrf.mxu0 }
 0x2d3   :  { %v798_v12 = vpop.f32.mrf.mxu0 }
 0x2d4   :  { %v799_v13 = vadd.f32 %v798_v12, %v797_v9 }
 0x2d6   :  { %v1051_v15 = vadd.f32 %v799_v13, %v465_v11 }
 0x2d8   :  { %v554_v16 = vsel %vm254_vm0, %v1051_v15, 0.0  ;;  %v561_v17 = vmul.f32 %v1051_v15, %v1051_v15 }
 0x2d9   :  { %v555_v18 = vrot.slane %v554_v16, 4 }
 0x2da   :  { %v562_v20 = vsel %vm254_vm0, %v561_v17, 0.0 }
 0x2db   :  { %v556_v21 = vadd.f32 %v555_v18, %v554_v16  ;;  %v563_v22 = vrot.slane %v562_v20, 4 }
 0x2dd   :  { %v557_v23 = vrot.slane %v556_v21, 2  ;;  %v564_v25 = vadd.f32 %v563_v22, %v562_v20 }
 0x2df   :  { %v558_v26 = vadd.f32 %v557_v23, %v556_v21  ;;  %v565_v27 = vrot.slane %v564_v25, 2 }
 0x2e1   :  { %v559_v28 = vrot.slane %v558_v26, 1  ;;  %v566_v29 = vadd.f32 %v565_v27, %v564_v25 }
 0x2e3   :  { %v567_v30 = vrot.slane %v566_v29, 1  ;;  %v560_v31 = vadd.f32 %v559_v28, %v558_v26 }
 0x2e5   :  { %v568_v32 = vadd.f32 %v567_v30, %v566_v29 }
 0x2e7   :  { %v569_v33 = vsel %vm287_vm1, %v560_v31, %v568_v32 }
 0x2e8   :  { %867 = vmatmul.mubr.f32.vlgmr.msra.gmra.mxu1 %v569_v33 }
 0x3a8   :  { %v636_v49 = vpop.f32.mrf.mxu1 }
 0x3a9   :  { %v640_v50 = vmul.f32 %v636_v49, %v636_v49  ;;  %v652_v56 = vrot.slane %v636_v49, %v997_v4 }
 0x3aa   :  { %v868_v51 = vpop.f32.mrf.mxu1 }
 0x3ab   :  { %v642_v52 = vrot.slane %v640_v50, 7  ;;  %v653_v59 = vsub.f32 %v1051_v15, %v652_v56 }
 0x3ad   :  { %v644_v53 = vsub.f32 %v636_v49, %v642_v52 }
 0x3af   :  { %v645_v54 = vmax.f32 %v644_v53, 0.0 }
 0x3b1   :  { %v646_v24 = vadd.f32 1e-05, %v645_v54 }
 0x3b3   :  { %915 = vrsqrt.f32 %v646_v24 }
 0x3c0   :  { %v916_v57 = vpop.eup %915 }
 0x3c1   :  { %v648_v58 = vmul.f32 %v916_v57, %v552_v55 }
 0x3c3   :  { %v657_v60 = vrot.slane %v648_v58, %v1000_v6 }
 0x3c5   :  { %v658_v19 = vmul.f32 %v657_v60, %v653_v59 }
 0x3c7   :  { %v659_v10 = vadd.f32 %v658_v19, %v553_v61 }
 0x3c9   :  { %902 = vmatmul.mubr.f32.vlgmr.msra.gmra.mxu0 %v659_v10 }
 0x489   :  { %v743_v62 = vpop.f32.mrf.mxu0 }
 0x48a   :  { %v744_v63 = vadd.f32 %v743_v62, %v676_v14 }
 0x48b   :  { %v903_v0 = vpop.f32.mrf.mxu0 }
 0x48c   :  { %748 = vst.msk [vmem:[#allocation5] sm:$0x3] %vm747_vm3, %v744_v63 }
 0x48d   :  { %948 = shalt.err (!%p945_p9)
}
 0x48e   :  { %758 = dma.vmem_to_hbm [thread:$0]  %s756_s17, 32, %s1083_s2, [#allocation4]  }
 0x48f   :  { %959 = dma.done.wait [#allocation4], 32  }
 0x490   :  { %960 = vsyncadd [#allocation4], 4294967264 }
 0x491   :  { %762 = vsyncpa [#allocation3], 1 }
 0x492   :  { %763 = vsyncpa [#allocation4], 1 }

</bundles_post_ra>
